<compile_context>
chip_gen: v5e
topology: v5e:2x2
jax: 0.10.0
libtpu: 0.0.40
codegen_flags: <defaults>
</compile_context>

<pallas_src>
import functools

import numpy as np

import jax
import jax.numpy as jnp
from jax.experimental import pallas as pl
from jax.experimental.pallas import tpu as pltpu

C_IN = 4        # input channels of x
C_FEAT = 16     # backbone feature channels feeding segmentation_head
C_SEG = 3       # segmentation_head output channels
C_CAT = 6       # channels after cat((y, x[:, 0:3]), dim=1)
C_OUT = 3       # final output channels
K = 3           # segmentation_head kernel size
C_PROJ = C_FEAT + C_OUT          # backbone features + folded-in skip rows
TAP_ROWS = 8                     # each 3-row tap block padded to a sublane tile
BIAS_ROWS = 32                   # packed bias column: [b0 | bf | 0 | bc | 0]
BC_ROW = 24                      # 8-aligned start of the bc block
MXU_DTYPE = jnp.bfloat16         # MXU operand dtype (accumulation stays f32)

# pltpu.roll follows jnp.roll semantics (out[..., i] = in[..., i - shift]);
# the previous runtime device probe is gone (it broke AOT tracing and cost an
# extra pallas_call compile), the shift sign below is a static constant.


@functools.lru_cache(maxsize=None)
def _tap_masks(h, w, g):
    """(K*K*TAP_ROWS, g*h*w) f32 validity masks, one 8-row block per tap.

    Block t=(kh,kw) is 1 where reading (row+kh-1, col+kw-1) stays inside the
    h x w image and 0 where the "same" conv would read implicit zero padding.
    Those zeros also cover every lane the in-kernel roll wraps across sample
    or array boundaries, so folding the batch into lanes is safe.
    """
    hh = np.repeat(np.arange(h), w)
    ww = np.tile(np.arange(w), h)
    blocks = []
    for kh in range(K):
        for kw in range(K):
            m = ((hh + kh - 1 >= 0) & (hh + kh - 1 < h) &
                 (ww + kw - 1 >= 0) & (ww + kw - 1 < w)).astype(np.float32)
            blocks.append(np.broadcast_to(np.tile(m, g), (TAP_ROWS, g * h * w)))
    return jnp.asarray(np.concatenate(blocks, axis=0))


def xmodel_kernel(x_ref, waug_ref, wseg_ref, wf3_ref, bias_ref, mask_ref,
                  o_ref, *, img_w, lanes):
    # x_ref: (1, C_IN, L)   o_ref: (1, C_OUT, L)   L = samples_per_step*H*W
    x = x_ref[0]                                           # (C_IN, L) f32
    bias = bias_ref[...]                                   # (BIAS_ROWS, 1) f32

    # Backbone stand-in (1x1 conv C_IN->C_FEAT) fused with the skip half of
    # `final` (wfx @ x[0:3] + bf) into a single MXU matmul.
    # TODO(synk): the wrapped `model` backbone is unspecified in XModel; a
    # deterministic 1x1 projection stands in for everything before
    # segmentation_head.
    proj = jnp.dot(waug_ref[...], x.astype(MXU_DTYPE),
                   preferred_element_type=jnp.float32)     # (C_PROJ, L)
    proj = proj + bias[0:C_PROJ]
    feat = proj[0:C_FEAT]                                  # (16, L)
    skip = proj[C_FEAT:C_PROJ]                             # (3, L) = wfx@x[:3]+bf

    # segmentation_head: ConvTranspose2d(16,3,3,s=1,p=1) + ReLU.
    # One matmul for all nine taps, then roll/mask the cheap 8-row outputs.
    z = jnp.dot(wseg_ref[...], feat.astype(MXU_DTYPE),
                preferred_element_type=jnp.float32)        # (72, L)
    acc = z[4 * TAP_ROWS:5 * TAP_ROWS]                     # centre tap: no roll/mask
    for t in range(K * K):
        if t == 4:
            continue
        kh, kw = divmod(t, K)
        off = (kh - 1) * img_w + (kw - 1)
        shift = (-off) % lanes                             # jnp.roll direction
        zt = pltpu.roll(z[t * TAP_ROWS:(t + 1) * TAP_ROWS], shift, axis=1)
        acc = acc + zt * mask_ref[pl.ds(t * TAP_ROWS, TAP_ROWS)]
    y3 = jnp.maximum(acc + bias[BC_ROW:BC_ROW + TAP_ROWS], 0.0)   # (8, L)

    # final: 1x1 ConvTranspose2d(6,3) over cat((y3, x[:,0:3])) + Tanh; the
    # x-half is already in `skip`, so one more matmul finishes the kernel.
    y = jnp.dot(wf3_ref[...], y3.astype(MXU_DTYPE),
                preferred_element_type=jnp.float32) + skip
    o_ref[0] = jnp.tanh(y)                                 # lane-dense store


def pack_params(w0_t, b0_t, wt_seg, bc_t, wt_fin, bf_t):
    """PyTorch-layout parameters -> the four packed kernel operands."""
    wf = wt_fin[:, :, 0, 0]                                # (C_CAT, C_OUT) [in,out]
    # backbone 1x1 + skip 1x1 (x[:,0:3] half of `final`) share one projection
    w_aug = jnp.zeros((C_PROJ, C_IN), jnp.float32)
    w_aug = w_aug.at[0:C_FEAT].set(w0_t)
    w_aug = w_aug.at[C_FEAT:C_PROJ, 0:C_SEG].set(wf[C_SEG:].T)
    # ConvTranspose2d(s=1,p=1) == "same" conv with flipped/transposed weight;
    # nine 3x16 tap weights stacked, each padded to an 8-row sublane tile.
    wc = jnp.transpose(jnp.flip(wt_seg, axis=(2, 3)), (2, 3, 0, 1))  # (K,K,16,3)
    w_seg = jnp.zeros((K * K * TAP_ROWS, C_FEAT), jnp.float32)
    for t in range(K * K):
        kh, kw = divmod(t, K)
        w_seg = w_seg.at[t * TAP_ROWS:t * TAP_ROWS + C_SEG].set(wc[kh, kw].T)
    # y3 half of `final`, padded to the 8 accumulator rows
    wf3 = jnp.zeros((C_OUT, TAP_ROWS), jnp.float32)
    wf3 = wf3.at[:, 0:C_SEG].set(wf[0:C_SEG].T)
    # all three biases packed into one column (bc block starts 8-aligned)
    biases = jnp.zeros((BIAS_ROWS, 1), jnp.float32)
    biases = biases.at[0:C_FEAT, 0].set(b0_t)
    biases = biases.at[C_FEAT:C_PROJ, 0].set(bf_t)
    biases = biases.at[BC_ROW:BC_ROW + C_SEG, 0].set(bc_t)
    return (w_aug.astype(MXU_DTYPE), w_seg.astype(MXU_DTYPE),
            wf3.astype(MXU_DTYPE), biases)


@jax.jit
def xmodel_forward(x_nchw, packed):
    """x_nchw: (N, C_IN, H, W) float32 -> (N, C_OUT, H, W) float32."""
    w_aug, w_seg, wf3, biases = packed
    N, C, H, W = x_nchw.shape
    assert C == C_IN
    HW = H * W

    # Fold as many samples as possible into the lane axis (>=512-lane tiles
    # amortize per-step overhead and keep every vst unmasked / lane-dense).
    # TODO(synk): on v7x keep >=2 grid steps per TensorCore once N grows, and
    # re-budget tiles / vmem_limit_bytes for its 64 MiB VMEM at real
    # resolutions (add an H-row grid axis with per-tile halo masks; the
    # roll-wrap trick needs per-tile masks or a +-W halo there).
    g = 1
    for d in range(1, N + 1):
        if N % d == 0 and d * HW <= 4096:
            g = d
    ng = N // g
    L = g * HW

    # (N, C, H, W) -> (ng, C, g*H*W): channels-major, samples folded on lanes.
    xp = (x_nchw.reshape(ng, g, C_IN, HW)
          .transpose(0, 2, 1, 3).reshape(ng, C_IN, L))
    masks = _tap_masks(H, W, g)                            # (72, L), cached

    kernel = functools.partial(xmodel_kernel, img_w=W, lanes=L)
    # NOTE: the five weight/bias/mask operands are grid-invariant; at scale
    # they could be single-buffered (pipeline_mode=pl.Buffered(1)) — at this
    # size the double buffer is a few KiB and left at the default.
    out = pl.pallas_call(
        kernel,
        out_shape=jax.ShapeDtypeStruct((ng, C_OUT, L), jnp.float32),
        grid_spec=pltpu.PrefetchScalarGridSpec(
            num_scalar_prefetch=0,
            grid=(ng,),
            in_specs=[
                pl.BlockSpec((1, C_IN, L), lambda n: (n, 0, 0)),
                pl.BlockSpec((C_PROJ, C_IN), lambda n: (0, 0)),
                pl.BlockSpec((K * K * TAP_ROWS, C_FEAT), lambda n: (0, 0)),
                pl.BlockSpec((C_OUT, TAP_ROWS), lambda n: (0, 0)),
                pl.BlockSpec((BIAS_ROWS, 1), lambda n: (0, 0)),
                pl.BlockSpec((K * K * TAP_ROWS, L), lambda n: (0, 0)),
            ],
            out_specs=pl.BlockSpec((1, C_OUT, L), lambda n: (n, 0, 0)),
        ),
        compiler_params=pltpu.CompilerParams(
            dimension_semantics=("parallel",)),
    )(xp, w_aug, w_seg, wf3, biases, masks)

    # (ng, C_OUT, g*HW) -> (N, C_OUT, H, W)
    return (out.reshape(ng, C_OUT, g, HW)
            .transpose(0, 2, 1, 3).reshape(N, C_OUT, H, W))


def reference_forward(x, torch_params):
    """Pure-JAX NCHW reference matching PyTorch semantics (f32, highest)."""
    w0_t, b0_t, wt_seg, bc_t, wt_fin, bf_t = torch_params
    Nb, _, H, W = x.shape
    # backbone stand-in (1x1 conv)
    feat = (jnp.einsum('nchw,fc->nfhw', x, w0_t, precision='highest')
            + b0_t[None, :, None, None])
    # segmentation_head: ConvTranspose2d(16,3,3,s=1,p=1) + ReLU
    wc = jnp.transpose(jnp.flip(wt_seg, axis=(2, 3)), (2, 3, 0, 1))
    pad = jnp.pad(feat, ((0, 0), (0, 0), (1, 1), (1, 1)))
    acc = jnp.zeros((Nb, C_SEG, H, W), jnp.float32)
    for dh in range(K):
        for dw in range(K):
            acc = acc + jnp.einsum('nihw,io->nohw',
                                   pad[:, :, dh:dh + H, dw:dw + W], wc[dh, dw],
                                   precision='highest')
    y3 = jax.nn.relu(acc + bc_t[None, :, None, None])
    # cat + final ConvTranspose2d(6,3,1) + Tanh
    y6 = jnp.concatenate([y3, x[:, 0:3]], axis=1)
    wf = wt_fin[:, :, 0, 0]
    return jnp.tanh(jnp.einsum('nihw,io->nohw', y6, wf, precision='highest')
                    + bf_t[None, :, None, None])


if __name__ == "__main__":
    key = jax.random.PRNGKey(0)
    ks = jax.random.split(key, 8)
    N, H, W = 2, 16, 16
    x = jax.random.normal(ks[0], (N, C_IN, H, W), jnp.float32)

    # deterministic PyTorch-layout parameters
    w0_t = 0.2 * jax.random.normal(ks[1], (C_FEAT, C_IN), jnp.float32)
    b0_t = 0.05 * jax.random.normal(ks[2], (C_FEAT,), jnp.float32)
    wt_seg = 0.15 * jax.random.normal(ks[3], (C_FEAT, C_SEG, K, K), jnp.float32)  # ConvTranspose2d(16,3,3)
    bc_t = 0.05 * jax.random.normal(ks[4], (C_SEG,), jnp.float32)
    wt_fin = 0.3 * jax.random.normal(ks[5], (C_CAT, C_OUT, 1, 1), jnp.float32)    # ConvTranspose2d(6,3,1)
    bf_t = 0.05 * jax.random.normal(ks[6], (C_OUT,), jnp.float32)

    packed = pack_params(w0_t, b0_t, wt_seg, bc_t, wt_fin, bf_t)
    out = jax.block_until_ready(xmodel_forward(x, packed))

    ref = reference_forward(x, (w0_t, b0_t, wt_seg, bc_t, wt_fin, bf_t))
    assert out.shape == (N, C_OUT, H, W)
    # bf16 MXU operands (f32 accumulation) -> loosened tolerance against the
    # highest-precision f32 reference.
    err = float(jnp.max(jnp.abs(out - ref)))
    assert jnp.allclose(out, ref, atol=3e-2, rtol=3e-2), err
    print("KERNEL_OK")
</pallas_src>

<mosaic_0001>
module attributes {stable_mosaic.version = 11 : i64} {
  func.func @xmodel_kernel(%arg0: i32, %arg1: memref<1x4x512xf32, #tpu.memory_space<vmem>>, %arg2: memref<19x4xbf16, #tpu.memory_space<vmem>>, %arg3: memref<72x16xbf16, #tpu.memory_space<vmem>>, %arg4: memref<3x8xbf16, #tpu.memory_space<vmem>>, %arg5: memref<32x1xf32, #tpu.memory_space<vmem>>, %arg6: memref<72x512xf32, #tpu.memory_space<vmem>>, %arg7: memref<1x3x512xf32, #tpu.memory_space<vmem>>) attributes {dimension_semantics = [#tpu.dimension_semantics<parallel>], iteration_bounds = array<i64: 1>, scalar_prefetch = 0 : i64, scratch_operands = 0 : i64, tpu.core_type = #tpu.core_type<tc>, window_params = [{transform_indices = @transform_0, window_bounds = array<i64: 1, 4, 512>}, {pipeline_mode = #tpu.pipeline_mode<synchronous>, transform_indices = @transform_1, window_bounds = array<i64: 19, 4>}, {pipeline_mode = #tpu.pipeline_mode<synchronous>, transform_indices = @transform_2, window_bounds = array<i64: 72, 16>}, {pipeline_mode = #tpu.pipeline_mode<synchronous>, transform_indices = @transform_3, window_bounds = array<i64: 3, 8>}, {pipeline_mode = #tpu.pipeline_mode<synchronous>, transform_indices = @transform_4, window_bounds = array<i64: 32, 1>}, {pipeline_mode = #tpu.pipeline_mode<synchronous>, transform_indices = @transform_5, window_bounds = array<i64: 72, 512>}, {transform_indices = @transform_6, window_bounds = array<i64: 1, 3, 512>}]} {
    %c0 = arith.constant 0 : index
    %c0_0 = arith.constant 0 : index
    %c0_1 = arith.constant 0 : index
    %0 = vector.load %arg1[%c0, %c0_0, %c0_1] : memref<1x4x512xf32, #tpu.memory_space<vmem>>, vector<1x4x512xf32>
    %1 = vector.shape_cast %0 : vector<1x4x512xf32> to vector<4x512xf32>
    %c0_2 = arith.constant 0 : index
    %c0_3 = arith.constant 0 : index
    %2 = vector.load %arg5[%c0_2, %c0_3] : memref<32x1xf32, #tpu.memory_space<vmem>>, vector<32x1xf32>
    %c0_4 = arith.constant 0 : index
    %c0_5 = arith.constant 0 : index
    %3 = vector.load %arg2[%c0_4, %c0_5] : memref<19x4xbf16, #tpu.memory_space<vmem>>, vector<19x4xbf16>
    %4 = arith.truncf %1 : vector<4x512xf32> to vector<4x512xbf16>
    %cst = arith.constant dense<0.000000e+00> : vector<19x512xf32>
    %5 = tpu.matmul %3, %4, %cst {dimension_numbers = #tpu.dot_dimension_numbers<[1], [0], [0], [1], [0, 0, 1, 1], [], []>} : vector<19x4xbf16>, vector<4x512xbf16>, vector<19x512xf32> -> vector<19x512xf32>
    %6 = vector.extract_strided_slice %2 {offsets = [0, 0], sizes = [19, 1], strides = [1, 1]} : vector<32x1xf32> to vector<19x1xf32>
    %7 = vector.broadcast %6 : vector<19x1xf32> to vector<19x512xf32>
    %8 = arith.addf %5, %7 : vector<19x512xf32>
    %9 = vector.extract_strided_slice %8 {offsets = [0, 0], sizes = [16, 512], strides = [1, 1]} : vector<19x512xf32> to vector<16x512xf32>
    %10 = vector.extract_strided_slice %8 {offsets = [16, 0], sizes = [3, 512], strides = [1, 1]} : vector<19x512xf32> to vector<3x512xf32>
    %c0_6 = arith.constant 0 : index
    %c0_7 = arith.constant 0 : index
    %11 = vector.load %arg3[%c0_6, %c0_7] : memref<72x16xbf16, #tpu.memory_space<vmem>>, vector<72x16xbf16>
    %12 = arith.truncf %9 : vector<16x512xf32> to vector<16x512xbf16>
    %cst_8 = arith.constant dense<0.000000e+00> : vector<72x512xf32>
    %13 = tpu.matmul %11, %12, %cst_8 {dimension_numbers = #tpu.dot_dimension_numbers<[1], [0], [0], [1], [0, 0, 1, 1], [], []>} : vector<72x16xbf16>, vector<16x512xbf16>, vector<72x512xf32> -> vector<72x512xf32>
    %14 = vector.extract_strided_slice %13 {offsets = [32, 0], sizes = [8, 512], strides = [1, 1]} : vector<72x512xf32> to vector<8x512xf32>
    %15 = vector.extract_strided_slice %13 {offsets = [0, 0], sizes = [8, 512], strides = [1, 1]} : vector<72x512xf32> to vector<8x512xf32>
    %c17_i32 = arith.constant 17 : i32
    %16 = tpu.dynamic_rotate %15 by %c17_i32 dim 1 : vector<8x512xf32>, i32 -> vector<8x512xf32>
    %c0_9 = arith.constant 0 : index
    %c0_10 = arith.constant 0 : index
    %17 = vector.load %arg6[%c0_9, %c0_10] : memref<72x512xf32, #tpu.memory_space<vmem>>, vector<8x512xf32>
    %18 = arith.mulf %16, %17 : vector<8x512xf32>
    %19 = arith.addf %14, %18 : vector<8x512xf32>
    %20 = vector.extract_strided_slice %13 {offsets = [8, 0], sizes = [8, 512], strides = [1, 1]} : vector<72x512xf32> to vector<8x512xf32>
    %c16_i32 = arith.constant 16 : i32
    %21 = tpu.dynamic_rotate %20 by %c16_i32 dim 1 : vector<8x512xf32>, i32 -> vector<8x512xf32>
    %c8 = arith.constant 8 : index
    %c0_11 = arith.constant 0 : index
    %22 = vector.load %arg6[%c8, %c0_11] : memref<72x512xf32, #tpu.memory_space<vmem>>, vector<8x512xf32>
    %23 = arith.mulf %21, %22 : vector<8x512xf32>
    %24 = arith.addf %19, %23 : vector<8x512xf32>
    %25 = vector.extract_strided_slice %13 {offsets = [16, 0], sizes = [8, 512], strides = [1, 1]} : vector<72x512xf32> to vector<8x512xf32>
    %c15_i32 = arith.constant 15 : i32
    %26 = tpu.dynamic_rotate %25 by %c15_i32 dim 1 : vector<8x512xf32>, i32 -> vector<8x512xf32>
    %c16 = arith.constant 16 : index
    %c0_12 = arith.constant 0 : index
    %27 = vector.load %arg6[%c16, %c0_12] : memref<72x512xf32, #tpu.memory_space<vmem>>, vector<8x512xf32>
    %28 = arith.mulf %26, %27 : vector<8x512xf32>
    %29 = arith.addf %24, %28 : vector<8x512xf32>
    %30 = vector.extract_strided_slice %13 {offsets = [24, 0], sizes = [8, 512], strides = [1, 1]} : vector<72x512xf32> to vector<8x512xf32>
    %c1_i32 = arith.constant 1 : i32
    %31 = tpu.dynamic_rotate %30 by %c1_i32 dim 1 : vector<8x512xf32>, i32 -> vector<8x512xf32>
    %c24 = arith.constant 24 : index
    %c0_13 = arith.constant 0 : index
    %32 = vector.load %arg6[%c24, %c0_13] : memref<72x512xf32, #tpu.memory_space<vmem>>, vector<8x512xf32>
    %33 = arith.mulf %31, %32 : vector<8x512xf32>
    %34 = arith.addf %29, %33 : vector<8x512xf32>
    %35 = vector.extract_strided_slice %13 {offsets = [40, 0], sizes = [8, 512], strides = [1, 1]} : vector<72x512xf32> to vector<8x512xf32>
    %c511_i32 = arith.constant 511 : i32
    %36 = tpu.dynamic_rotate %35 by %c511_i32 dim 1 : vector<8x512xf32>, i32 -> vector<8x512xf32>
    %c40 = arith.constant 40 : index
    %c0_14 = arith.constant 0 : index
    %37 = vector.load %arg6[%c40, %c0_14] : memref<72x512xf32, #tpu.memory_space<vmem>>, vector<8x512xf32>
    %38 = arith.mulf %36, %37 : vector<8x512xf32>
    %39 = arith.addf %34, %38 : vector<8x512xf32>
    %40 = vector.extract_strided_slice %13 {offsets = [48, 0], sizes = [8, 512], strides = [1, 1]} : vector<72x512xf32> to vector<8x512xf32>
    %c497_i32 = arith.constant 497 : i32
    %41 = tpu.dynamic_rotate %40 by %c497_i32 dim 1 : vector<8x512xf32>, i32 -> vector<8x512xf32>
    %c48 = arith.constant 48 : index
    %c0_15 = arith.constant 0 : index
    %42 = vector.load %arg6[%c48, %c0_15] : memref<72x512xf32, #tpu.memory_space<vmem>>, vector<8x512xf32>
    %43 = arith.mulf %41, %42 : vector<8x512xf32>
    %44 = arith.addf %39, %43 : vector<8x512xf32>
    %45 = vector.extract_strided_slice %13 {offsets = [56, 0], sizes = [8, 512], strides = [1, 1]} : vector<72x512xf32> to vector<8x512xf32>
    %c496_i32 = arith.constant 496 : i32
    %46 = tpu.dynamic_rotate %45 by %c496_i32 dim 1 : vector<8x512xf32>, i32 -> vector<8x512xf32>
    %c56 = arith.constant 56 : index
    %c0_16 = arith.constant 0 : index
    %47 = vector.load %arg6[%c56, %c0_16] : memref<72x512xf32, #tpu.memory_space<vmem>>, vector<8x512xf32>
    %48 = arith.mulf %46, %47 : vector<8x512xf32>
    %49 = arith.addf %44, %48 : vector<8x512xf32>
    %50 = vector.extract_strided_slice %13 {offsets = [64, 0], sizes = [8, 512], strides = [1, 1]} : vector<72x512xf32> to vector<8x512xf32>
    %c495_i32 = arith.constant 495 : i32
    %51 = tpu.dynamic_rotate %50 by %c495_i32 dim 1 : vector<8x512xf32>, i32 -> vector<8x512xf32>
    %c64 = arith.constant 64 : index
    %c0_17 = arith.constant 0 : index
    %52 = vector.load %arg6[%c64, %c0_17] : memref<72x512xf32, #tpu.memory_space<vmem>>, vector<8x512xf32>
    %53 = arith.mulf %51, %52 : vector<8x512xf32>
    %54 = arith.addf %49, %53 : vector<8x512xf32>
    %55 = vector.extract_strided_slice %2 {offsets = [24, 0], sizes = [8, 1], strides = [1, 1]} : vector<32x1xf32> to vector<8x1xf32>
    %56 = vector.broadcast %55 : vector<8x1xf32> to vector<8x512xf32>
    %57 = arith.addf %54, %56 : vector<8x512xf32>
    %cst_18 = arith.constant 0.000000e+00 : f32
    %58 = vector.broadcast %cst_18 : f32 to vector<8x512xf32>
    %59 = arith.maximumf %57, %58 : vector<8x512xf32>
    %c0_19 = arith.constant 0 : index
    %c0_20 = arith.constant 0 : index
    %60 = vector.load %arg4[%c0_19, %c0_20] : memref<3x8xbf16, #tpu.memory_space<vmem>>, vector<3x8xbf16>
    %61 = arith.truncf %59 : vector<8x512xf32> to vector<8x512xbf16>
    %cst_21 = arith.constant dense<0.000000e+00> : vector<3x512xf32>
    %62 = tpu.matmul %60, %61, %cst_21 {dimension_numbers = #tpu.dot_dimension_numbers<[1], [0], [0], [1], [0, 0, 1, 1], [], []>} : vector<3x8xbf16>, vector<8x512xbf16>, vector<3x512xf32> -> vector<3x512xf32>
    %63 = arith.addf %62, %10 : vector<3x512xf32>
    %64 = math.tanh %63 : vector<3x512xf32>
    %c0_22 = arith.constant 0 : index
    %c0_23 = arith.constant 0 : index
    %c0_24 = arith.constant 0 : index
    %65 = vector.load %arg7[%c0_22, %c0_23, %c0_24] : memref<1x3x512xf32, #tpu.memory_space<vmem>>, vector<1x3x512xf32>
    %66 = vector.shape_cast %65 : vector<1x3x512xf32> to vector<3x512xf32>
    %67 = vector.shape_cast %64 : vector<3x512xf32> to vector<1x3x512xf32>
    tpu.vector_store %arg7[%c0_22, %c0_23, %c0_24], %67 {strides = array<i32>} : memref<1x3x512xf32, #tpu.memory_space<vmem>>, vector<1x3x512xf32>,
    return
  }
  func.func @transform_0(%arg0: i32) -> (i32, i32, i32) {
    %c0_i32 = arith.constant 0 : i32
    %c0_i32_0 = arith.constant 0 : i32
    %c0_i32_1 = arith.constant 0 : i32
    return %arg0, %c0_i32, %c0_i32_0 : i32, i32, i32
  }
  func.func @transform_1(%arg0: i32) -> (i32, i32) {
    %c0_i32 = arith.constant 0 : i32
    %c0_i32_0 = arith.constant 0 : i32
    %c0_i32_1 = arith.constant 0 : i32
    return %c0_i32, %c0_i32_0 : i32, i32
  }
  func.func @transform_2(%arg0: i32) -> (i32, i32) {
    %c0_i32 = arith.constant 0 : i32
    %c0_i32_0 = arith.constant 0 : i32
    %c0_i32_1 = arith.constant 0 : i32
    return %c0_i32, %c0_i32_0 : i32, i32
  }
  func.func @transform_3(%arg0: i32) -> (i32, i32) {
    %c0_i32 = arith.constant 0 : i32
    %c0_i32_0 = arith.constant 0 : i32
    %c0_i32_1 = arith.constant 0 : i32
    return %c0_i32, %c0_i32_0 : i32, i32
  }
  func.func @transform_4(%arg0: i32) -> (i32, i32) {
    %c0_i32 = arith.constant 0 : i32
    %c0_i32_0 = arith.constant 0 : i32
    %c0_i32_1 = arith.constant 0 : i32
    return %c0_i32, %c0_i32_0 : i32, i32
  }
  func.func @transform_5(%arg0: i32) -> (i32, i32) {
    %c0_i32 = arith.constant 0 : i32
    %c0_i32_0 = arith.constant 0 : i32
    %c0_i32_1 = arith.constant 0 : i32
    return %c0_i32, %c0_i32_0 : i32, i32
  }
  func.func @transform_6(%arg0: i32) -> (i32, i32, i32) {
    %c0_i32 = arith.constant 0 : i32
    %c0_i32_0 = arith.constant 0 : i32
    %c0_i32_1 = arith.constant 0 : i32
    return %arg0, %c0_i32, %c0_i32_0 : i32, i32, i32
  }
}

</mosaic_0001>

<bundles_post_ra>
// kernel: xmodel_forward.1
= control target key start
LH: loop header
LB: loop body
LE: loop exit
PB: predicated region body
PF: predicated region fallthrough
CT: control target
= control target key end

     0   :  { %11 = vsyncpa [#allocation3], 0  ;;  %s780_s24 = smov [#allocation2]   ;;  %s781_s26 = smov 512   ;;  %s1056_s0 = inlined_call_operand.vmem [shape: f32[1,4,512], index: 0, kind: input, shape index: {}]   ;;  %s1057_s1 = inlined_call_operand.vmem [shape: bf16[19,4], index: 1, kind: input, shape index: {}]   ;;  %s1058_s2 = inlined_call_operand.vmem [shape: bf16[72,16], index: 2, kind: input, shape index: {}]   ;;  %s1059_s3 = inlined_call_operand.vmem [shape: bf16[3,8], index: 3, kind: input, shape index: {}]   ;;  %s1060_s4 = inlined_call_operand.vmem [shape: f32[32,1], index: 4, kind: input, shape index: {}]   ;;  %s1061_s5 = inlined_call_operand.hbm [shape: f32[72,512], index: 5, kind: input, shape index: {}]   ;;  %s1062_s6 = inlined_call_operand.vmem [shape: f32[1,3,512], index: 6, kind: output, shape index: {}]  }
   0x1   :  { %s26_s23 = sshll.u32 %s1061_s5, 4  ;;  %s28_s25 = sshll.u32 %s780_s24, 4  ;;  %s27_s23 = int_to_ptr.hbm [resolvable:$true] %s26_s23  ;;  %s29_s25 = int_to_ptr.vmem [resolvable:$true] %s28_s25 }
   0x2   :  { %s782_s27 = smov 32  }
   0x3   :  { %34 = dma.hbm_to_vmem [thread:$0]  %s27_s23, 4608, %s29_s25, [#allocation3], %s781_s26, %s781_s26, %s782_s27  }
   0x4   :  { %778 = dma.done.wait [#allocation3], 4608  }
   0x5   :  { %779 = vsyncadd [#allocation3], 4294962688  ;;  %v783_v0 = vmov 0   ;;  %v40_v1 = vld [vmem:[%s1056_s0] sm:$0xff]  ;;  %v41_v2 = vld [vmem:[%s1056_s0 + $0x8] sm:$0xff]  ;;  %vm96_vm0 = vcmask 1041408  }
   0x6   :  { %744 = vset.pattern.permute.xlu0 %v783_v0  ;;  %745 = vset.pattern.permute.xlu2 %v783_v0  ;;  %51 = vst [vmem:[#allocation1] ss:$2 sm:$0xff] %v40_v1  ;;  %v42_v3 = vld [vmem:[%s1060_s4] sm:$0xff]  ;;  %v43_v4 = vld [vmem:[%s1060_s4 + $0x8] sm:$0xff]  ;;  %vm89_vm1 = vcmask 31744   ;;  %vm217_vm2 = vcmask 130048  }
   0x7   :  { %53 = vst [vmem:[#allocation1 + $0x10] ss:$2 sm:$0xff] %v41_v2  ;;  %68 = vperm.xlu0 %744, %v42_v3   ;;  %v727_v15 = vld [vmem:[%s1057_s1] sm:$0xff]  ;;  %v48_v18 = vld [vmem:[%s1057_s1 + $0x8] sm:$0x3]  ;;  %v730_v45 = vld [vmem:[%s1058_s2 + $0x10] sm:$0xff] }
   0x8   :  { %v86_v19 = vunpack.c.l.b16 %v48_v18  ;;  %v728_v35 = vld [vmem:[%s1058_s2] sm:$0xff]  ;;  %v729_v44 = vld [vmem:[%s1058_s2 + $0x8] sm:$0xff]  ;;  %v731_v46 = vld [vmem:[%s1058_s2 + $0x18] sm:$0xff]  ;;  %s785_s23 = smov 16   ;;  %s786_s24 = smov 15   ;;  %vm589_vm11 = vcmask 1043456  }
   0x9   :  { %v189_v47 = vld [vmem:[%s1058_s2 + $0x20] sm:$0xf]  ;;  %s784_s2 = smov 17   ;;  %s787_s25 = smov 1   ;;  %vm585_vm12 = vcmask 64512  }
   0xa   :  { %v88_v20 = vpack.c.b16 %v86_v19, %v86_v19  ;;  %v211_v48 = vunpack.c.l.b16 %v189_v47  ;;  %s788_s26 = smov 127   ;;  %s789_s27 = smov 113  }
   0xb   :  { %s790_s28 = smov 111   ;;  %s791_s29 = smov 112  }
   0xc   :  { %v216_v51 = vpack.c.b16 %v211_v48, %v211_v48 }
   0xd   :  { %v54_v5 = vld.sshfl [vmem:[#allocation1] sm:$0xff pattern:$0x75316420]  ;;  %v55_v6 = vld.sshfl [vmem:[#allocation1 + $0x8] sm:$0xff pattern:$0x75316420] }
   0xe   :  { %v62_v7 = vpack.c.bf16 %v54_v5, %v54_v5  ;;  %v63_v8 = vpack.c.bf16 %v55_v6, %v55_v6  ;;  %v56_v9 = vld.sshfl [vmem:[#allocation1 + $0x10] sm:$0xff pattern:$0x75316420]  ;;  %v57_v10 = vld.sshfl [vmem:[#allocation1 + $0x18] sm:$0xff pattern:$0x75316420] }
   0xf   :  { %v64_v11 = vpack.c.bf16 %v56_v9, %v56_v9  ;;  %v65_v12 = vpack.c.bf16 %v57_v10, %v57_v10  ;;  %73 = vperm.xlu0 %744, %v43_v4  }
  0x10   :  { %v98_v13 = vsel %vm96_vm0, %v62_v7, 0  ;;  %v101_v14 = vsel %vm96_vm0, %v63_v8, 0 }
  0x11   :  { %116 = vmatpush.bf16.msra.mxu0 %v98_v13  ;;  %134 = vmatpush.bf16.msra.mxu1 %v101_v14  ;;  %v104_v16 = vsel %vm96_vm0, %v64_v11, 0  ;;  %v107_v17 = vsel %vm96_vm0, %v65_v12, 0 }
  0x12   :  { %152 = vmatpush.bf16.msra.mxu2 %v104_v16  ;;  %170 = vmatpush.bf16.msra.mxu3 %v107_v17 }
  0x14   :  { %679 = vmatmul.msk.bf16.vlgmr.msra.gmra.mxu0 %vm89_vm1, %v727_v15  ;;  %681 = vmatmul.msk.bf16.vlgmr.msra.gmra.mxu1 %vm89_vm1, %v727_v15 }
  0x15   :  { %683 = vmatmul.msk.bf16.vlgmr.msra.gmra.mxu2 %vm89_vm1, %v727_v15  ;;  %685 = vmatmul.msk.bf16.vlgmr.msra.gmra.mxu3 %vm89_vm1, %v727_v15 }
  0x24   :  { %680 = vmatmul.msk.bf16.gmra.mxu0 %vm89_vm1, %v88_v20  ;;  %682 = vmatmul.msk.bf16.gmra.mxu1 %vm89_vm1, %v88_v20 }
  0x25   :  { %686 = vmatmul.msk.bf16.gmra.mxu3 %vm89_vm1, %v88_v20  ;;  %684 = vmatmul.msk.bf16.gmra.mxu2 %vm89_vm1, %v88_v20 }
  0x79   :  { %v69_v21 = vpop.permute.xlu0 %68 }
  0x81   :  { %v74_v24 = vpop.permute.xlu0 %73 }
  0x91   :  { %v118_v22 = vpop.f32.mrf.mxu0  ;;  %v136_v23 = vpop.f32.mrf.mxu1 }
  0x92   :  { %v119_v29 = vadd.f32 %v118_v22, %v69_v21  ;;  %v137_v30 = vadd.f32 %v136_v23, %v69_v21 }
  0x98   :  { %v154_v25 = vpop.f32.mrf.mxu2  ;;  %v172_v26 = vpop.f32.mrf.mxu3 }
  0x99   :  { %v120_v27 = vpop.f32.mrf.mxu0  ;;  %v138_v28 = vpop.f32.mrf.mxu1  ;;  %v155_v36 = vadd.f32 %v154_v25, %v69_v21  ;;  %v173_v39 = vadd.f32 %v172_v26, %v69_v21 }
  0x9a   :  { %v121_v31 = vadd.f32 %v120_v27, %v74_v24  ;;  %v139_v32 = vadd.f32 %v138_v28, %v74_v24 }
  0x9c   :  { %v190_v33 = vpack.c.bf16 %v121_v31, %v119_v29  ;;  %v191_v34 = vpack.c.bf16 %v139_v32, %v137_v30 }
  0x9e   :  { %240 = vmatpush.bf16.msrb.mxu0 %v190_v33  ;;  %273 = vmatpush.bf16.msrb.mxu1 %v191_v34  ;;  %v45_v34 = vld [vmem:[%s1060_s4 + $0x18] sm:$0xff] }
  0xa0   :  { %v156_v37 = vpop.f32.mrf.mxu2  ;;  %v174_v38 = vpop.f32.mrf.mxu3 }
  0xa1   :  { %v157_v40 = vadd.f32 %v156_v37, %v74_v24  ;;  %v175_v41 = vadd.f32 %v174_v38, %v74_v24  ;;  %703 = vmatmul.msk.bf16.vlgmr.msrb.gmra.mxu0 %vm217_vm2, %v728_v35  ;;  %708 = vmatmul.msk.bf16.vlgmr.msrb.gmra.mxu1 %vm217_vm2, %v728_v35  ;;  %v883_v49 = vpop.f32.mrf.mxu0  ;;  %v885_v50 = vpop.f32.mrf.mxu1  ;;  %v373_v37 = vlaneseq }
  0xa3   :  { %v192_v42 = vpack.c.bf16 %v157_v40, %v155_v36  ;;  %v193_v43 = vpack.c.bf16 %v175_v41, %v173_v39  ;;  %v909_v39 = vand.u32 127, %v373_v37 }
  0xa5   :  { %306 = vmatpush.bf16.msrb.mxu2 %v192_v42  ;;  %339 = vmatpush.bf16.msrb.mxu3 %v193_v43  ;;  %vm375_vm3 = vcmp.lt.s32.totalorder %v909_v39, 17  ;;  %v381_v43 = vld [vmem:[#allocation2 + $0x8] sm:$0xff]  ;;  %vm400_vm4 = vcmp.lt.s32.totalorder %v909_v39, 16  ;;  %vm425_vm5 = vcmp.lt.s32.totalorder %v909_v39, 15  ;;  %vm450_vm6 = vcmp.lt.s32.totalorder %v909_v39, 1 }
  0xa6   :  { %vm475_vm7 = vcmp.lt.s32.totalorder %v909_v39, 127  ;;  %vm500_vm8 = vcmp.lt.s32.totalorder %v909_v39, 113  ;;  %vm525_vm9 = vcmp.lt.s32.totalorder %v909_v39, 112  ;;  %vm550_vm10 = vcmp.lt.s32.totalorder %v909_v39, 111 }
  0xa8   :  { %713 = vmatmul.msk.bf16.vlgmr.msrb.gmra.mxu2 %vm217_vm2, %v728_v35  ;;  %718 = vmatmul.msk.bf16.vlgmr.msrb.gmra.mxu3 %vm217_vm2, %v728_v35  ;;  %v889_v52 = vpop.f32.mrf.mxu3  ;;  %v891_v53 = vpop.f32.mrf.mxu2  ;;  %v44_v35 = vld [vmem:[%s1060_s4 + $0x10] sm:$0xff] }
  0xa9   :  { %v125_v54 = vpop.f32.mrf.mxu0  ;;  %v143_v55 = vpop.f32.mrf.mxu1 }
  0xb0   :  { %v179_v56 = vpop.f32.mrf.mxu3  ;;  %v161_v57 = vpop.f32.mrf.mxu2 }
  0xb1   :  { %704 = vmatmul.msk.bf16.gmra.mxu0 %vm217_vm2, %v729_v44  ;;  %709 = vmatmul.msk.bf16.gmra.mxu1 %vm217_vm2, %v729_v44  ;;  %v382_v56 = vld [vmem:[#allocation2 + $0x10] sm:$0xff] }
  0xb8   :  { %714 = vmatmul.msk.bf16.gmra.mxu2 %vm217_vm2, %v729_v44  ;;  %719 = vmatmul.msk.bf16.gmra.mxu3 %vm217_vm2, %v729_v44 }
  0xc1   :  { %705 = vmatmul.msk.bf16.gmra.mxu0 %vm217_vm2, %v730_v45  ;;  %710 = vmatmul.msk.bf16.gmra.mxu1 %vm217_vm2, %v730_v45 }
  0xc8   :  { %715 = vmatmul.msk.bf16.gmra.mxu2 %vm217_vm2, %v730_v45  ;;  %720 = vmatmul.msk.bf16.gmra.mxu3 %vm217_vm2, %v730_v45  ;;  %v406_v45 = vld [vmem:[#allocation2 + $0x28] sm:$0xff] }
  0xd1   :  { %706 = vmatmul.msk.bf16.gmra.mxu0 %vm217_vm2, %v731_v46  ;;  %711 = vmatmul.msk.bf16.gmra.mxu1 %vm217_vm2, %v731_v46 }
  0xd8   :  { %716 = vmatmul.msk.bf16.gmra.mxu2 %vm217_vm2, %v731_v46  ;;  %721 = vmatmul.msk.bf16.gmra.mxu3 %vm217_vm2, %v731_v46 }
  0xe1   :  { %707 = vmatmul.msk.bf16.gmra.mxu0 %vm217_vm2, %v216_v51  ;;  %712 = vmatmul.msk.bf16.gmra.mxu1 %vm217_vm2, %v216_v51 }
  0xe8   :  { %717 = vmatmul.msk.bf16.gmra.mxu2 %vm217_vm2, %v216_v51  ;;  %722 = vmatmul.msk.bf16.gmra.mxu3 %vm217_vm2, %v216_v51 }
 0x11e   :  { %v242_v58 = vpop.f32.mrf.mxu0  ;;  %v275_v59 = vpop.f32.mrf.mxu1 }
 0x11f   :  { %367 = vrot.lane.b32.xlu2 %v275_v59, %s784_s2  ;;  %365 = vrot.lane.b32.xlu1 %v242_v58, %s784_s2  ;;  %v407_v58 = vld [vmem:[#allocation2 + $0x30] sm:$0xff] }
 0x126   :  { %v244_v60 = vpop.f32.mrf.mxu0  ;;  %v277_v61 = vpop.f32.mrf.mxu1 }
 0x127   :  { %394 = vrot.lane.b32.xlu1 %v277_v61, %s785_s23  ;;  %392 = vrot.lane.b32.xlu2 %v244_v60, %s785_s23 }
 0x12b   :  { %v308_v62 = vpop.f32.mrf.mxu2  ;;  %v341_v63 = vpop.f32.mrf.mxu3 }
 0x12e   :  { %v247_v0 = vpop.f32.mrf.mxu0  ;;  %v280_v1 = vpop.f32.mrf.mxu1 }
 0x12f   :  { %369 = vrot.lane.b32.xlu1 %v308_v62, %s784_s2  ;;  %419 = vrot.lane.b32.xlu2 %v280_v1, %s786_s24 }
 0x130   :  { %417 = vrot.lane.b32.xlu0 %v247_v0, %s786_s24 }
 0x133   :  { %v310_v2 = vpop.f32.mrf.mxu2  ;;  %v343_v3 = vpop.f32.mrf.mxu3 }
 0x136   :  { %v249_v4 = vpop.f32.mrf.mxu0  ;;  %v282_v5 = vpop.f32.mrf.mxu1 }
 0x137   :  { %371 = vrot.lane.b32.xlu1 %v341_v63, %s784_s2  ;;  %396 = vrot.lane.b32.xlu2 %v310_v2, %s785_s23 }
 0x138   :  { %398 = vrot.lane.b32.xlu0 %v343_v3, %s785_s23 }
 0x13b   :  { %v313_v6 = vpop.f32.mrf.mxu2  ;;  %v346_v7 = vpop.f32.mrf.mxu3 }
 0x13e   :  { %v895_v8 = vpop.f32.mrf.mxu0  ;;  %v897_v9 = vpop.f32.mrf.mxu1 }
 0x13f   :  { %421 = vrot.lane.b32.xlu2 %v313_v6, %s786_s24  ;;  %442 = vrot.lane.b32.xlu1 %v249_v4, %s787_s25 }
 0x140   :  { %444 = vrot.lane.b32.xlu0 %v282_v5, %s787_s25 }
 0x143   :  { %v315_v10 = vpop.f32.mrf.mxu2  ;;  %v348_v11 = vpop.f32.mrf.mxu3 }
 0x146   :  { %v254_v12 = vpop.f32.mrf.mxu0  ;;  %v287_v13 = vpop.f32.mrf.mxu1 }
 0x147   :  { %469 = vrot.lane.b32.xlu2 %v287_v13, %s788_s26  ;;  %448 = vrot.lane.b32.xlu1 %v348_v11, %s787_s25 }
 0x148   :  { %423 = vrot.lane.b32.xlu0 %v346_v7, %s786_s24 }
 0x14b   :  { %v899_v14 = vpop.f32.mrf.mxu2  ;;  %v901_v15 = vpop.f32.mrf.mxu3 }
 0x14e   :  { %v257_v16 = vpop.f32.mrf.mxu0  ;;  %v290_v17 = vpop.f32.mrf.mxu1 }
 0x14f   :  { %467 = vrot.lane.b32.xlu1 %v254_v12, %s788_s26  ;;  %492 = vrot.lane.b32.xlu2 %v257_v16, %s789_s27 }
 0x150   :  { %446 = vrot.lane.b32.xlu0 %v315_v10, %s787_s25 }
 0x153   :  { %v320_v18 = vpop.f32.mrf.mxu2  ;;  %v353_v19 = vpop.f32.mrf.mxu3 }
 0x156   :  { %v259_v20 = vpop.f32.mrf.mxu0  ;;  %v292_v21 = vpop.f32.mrf.mxu1 }
 0x157   :  { %471 = vrot.lane.b32.xlu1 %v320_v18, %s788_s26  ;;  %473 = vrot.lane.b32.xlu2 %v353_v19, %s788_s26  ;;  %v383_v18 = vld [vmem:[#allocation2 + $0x18] sm:$0xff] }
 0x158   :  { %494 = vrot.lane.b32.xlu0 %v290_v17, %s789_s27 }
 0x15b   :  { %v323_v22 = vpop.f32.mrf.mxu2  ;;  %v356_v23 = vpop.f32.mrf.mxu3 }
 0x15e   :  { %v262_v24 = vpop.f32.mrf.mxu0  ;;  %v295_v25 = vpop.f32.mrf.mxu1 }
 0x15f   :  { %542 = vrot.lane.b32.xlu1 %v262_v24, %s790_s28  ;;  %496 = vrot.lane.b32.xlu2 %v323_v22, %s789_s27 }
 0x160   :  { %517 = vrot.lane.b32.xlu0 %v259_v20, %s791_s29  ;;  %v380_v20 = vld [vmem:[#allocation2] sm:$0xff] }
 0x163   :  { %v325_v26 = vpop.f32.mrf.mxu2  ;;  %v358_v27 = vpop.f32.mrf.mxu3 }
 0x166   :  { %v264_v28 = vpop.f32.mrf.mxu0  ;;  %v297_v29 = vpop.f32.mrf.mxu1 }
 0x167   :  { %523 = vrot.lane.b32.xlu1 %v358_v27, %s791_s29  ;;  %v433_v28 = vld [vmem:[#allocation2 + $0x58] sm:$0xff] }
 0x168   :  { %498 = vrot.lane.b32.xlu0 %v356_v23, %s789_s27 }
 0x16b   :  { %v328_v30 = vpop.f32.mrf.mxu2  ;;  %v361_v31 = vpop.f32.mrf.mxu3 }
 0x16c   :  { %548 = vrot.lane.b32.xlu2 %v361_v31, %s790_s28 }
 0x16f   :  { %546 = vrot.lane.b32.xlu1 %v328_v30, %s790_s28 }
 0x170   :  { %521 = vrot.lane.b32.xlu0 %v325_v26, %s791_s29  ;;  %v408_v26 = vld [vmem:[#allocation2 + $0x38] sm:$0xff] }
 0x173   :  { %v330_v32 = vpop.f32.mrf.mxu2  ;;  %v363_v33 = vpop.f32.mrf.mxu3 }
 0x174   :  { %519 = vrot.lane.b32.xlu2 %v292_v21, %s791_s29  ;;  %v431_v32 = vld [vmem:[#allocation2 + $0x48] sm:$0xff] }
 0x177   :  { %544 = vrot.lane.b32.xlu1 %v295_v25, %s790_s28 }
 0x178   :  { %569 = vperm.xlu0 %744, %v45_v34   ;;  %v458_v34 = vld [vmem:[#allocation2 + $0x78] sm:$0xff] }
 0x179   :  { %v368_v36 = vpop.permute.xlu2 %367 }
 0x17c   :  { %78 = vperm.xlu2 %745, %v44_v35  }
 0x181   :  { %v393_v38 = vpop.permute.xlu2 %392 }
 0x189   :  { %v420_v42 = vpop.permute.xlu2 %419 }
 0x191   :  { %v366_v40 = vpop.permute.xlu1 %365  ;;  %v397_v54 = vpop.permute.xlu2 %396 }
 0x192   :  { %v378_v41 = vsel %vm375_vm3, %v366_v40, %v368_v36 }
 0x193   :  { %v385_v44 = vmul.f32 %v381_v43, %v378_v41  ;;  %v430_v41 = vld [vmem:[#allocation2 + $0x40] sm:$0xff] }
 0x195   :  { %v389_v48 = vadd.f32 %v385_v44, %v897_v9 }
 0x199   :  { %v395_v46 = vpop.permute.xlu1 %394  ;;  %v422_v1 = vpop.permute.xlu2 %421 }
 0x19a   :  { %v403_v47 = vsel %vm400_vm4, %v393_v38, %v395_v46  ;;  %v402_v59 = vsel %vm400_vm4, %v395_v46, %v397_v54  ;;  %v427_v44 = vsel %vm425_vm5, %v420_v42, %v422_v1  ;;  %v432_v46 = vld [vmem:[#allocation2 + $0x50] sm:$0xff] }
 0x19b   :  { %v410_v51 = vmul.f32 %v406_v45, %v403_v47  ;;  %v411_v63 = vmul.f32 %v407_v58, %v402_v59 }
 0x19d   :  { %v918_v55 = vadd.f32 %v410_v51, %v389_v48 }
 0x1a1   :  { %v370_v57 = vpop.permute.xlu1 %369  ;;  %v927_v5 = vpop.permute.xlu2 %469 }
 0x1a2   :  { %v377_v60 = vsel %vm375_vm3, %v368_v36, %v370_v57  ;;  %v418_v61 = vpop.permute.xlu0 %417  ;;  %v405_v36 = vld [vmem:[#allocation2 + $0x20] sm:$0xff] }
 0x1a3   :  { %v386_v62 = vmul.f32 %v382_v56, %v377_v60  ;;  %v428_v33 = vsel %vm425_vm5, %v418_v61, %v420_v42  ;;  %v457_v60 = vld [vmem:[#allocation2 + $0x70] sm:$0xff] }
 0x1a4   :  { %v435_v47 = vmul.f32 %v431_v32, %v428_v33  ;;  %v480_v32 = vld [vmem:[#allocation2 + $0xa0] sm:$0xff] }
 0x1a5   :  { %v390_v0 = vadd.f32 %v386_v62, %v899_v14 }
 0x1a7   :  { %v925_v2 = vadd.f32 %v411_v63, %v390_v0  ;;  %v483_v63 = vld [vmem:[#allocation2 + $0xb8] sm:$0xff] }
 0x1a9   :  { %v372_v3 = vpop.permute.xlu1 %371  ;;  %v933_v11 = vpop.permute.xlu2 %492 }
 0x1aa   :  { %v399_v4 = vpop.permute.xlu0 %398  ;;  %v376_v19 = vsel %vm375_vm3, %v370_v57, %v372_v3  ;;  %v379_v21 = vsel %vm375_vm3, %v372_v3, %v366_v40  ;;  %v456_v57 = vld [vmem:[#allocation2 + $0x68] sm:$0xff] }
 0x1ab   :  { %v387_v22 = vmul.f32 %v383_v18, %v376_v19  ;;  %v384_v25 = vmul.f32 %v380_v20, %v379_v21  ;;  %v401_v27 = vsel %vm400_vm4, %v397_v54, %v399_v4  ;;  %v404_v37 = vsel %vm400_vm4, %v399_v4, %v393_v38  ;;  %v482_v18 = vld [vmem:[#allocation2 + $0xb0] sm:$0xff]  ;;  %v455_v21 = vld [vmem:[#allocation2 + $0x60] sm:$0xff] }
 0x1ac   :  { %v412_v40 = vmul.f32 %v408_v26, %v401_v27  ;;  %v409_v38 = vmul.f32 %v405_v36, %v404_v37  ;;  %v439_v4 = vadd.f32 %v435_v47, %v918_v55  ;;  %v481_v26 = vld [vmem:[#allocation2 + $0xa8] sm:$0xff]  ;;  %v507_v27 = vld [vmem:[#allocation2 + $0xd0] sm:$0xff] }
 0x1ad   :  { %v391_v31 = vadd.f32 %v387_v22, %v901_v15  ;;  %v388_v45 = vadd.f32 %v384_v25, %v895_v8  ;;  %v506_v47 = vld [vmem:[#allocation2 + $0xc8] sm:$0xff] }
 0x1af   :  { %v416_v48 = vadd.f32 %v412_v40, %v391_v31  ;;  %v413_v62 = vadd.f32 %v409_v38, %v388_v45  ;;  %v533_v40 = vld [vmem:[#allocation2 + $0xf8] sm:$0xff]  ;;  %v532_v45 = vld [vmem:[#allocation2 + $0xf0] sm:$0xff] }
 0x1b1   :  { %v929_v6 = vpop.permute.xlu1 %442  ;;  %v474_v16 = vpop.permute.xlu2 %473 }
 0x1b2   :  { %v445_v7 = vpop.permute.xlu0 %444 }
 0x1b3   :  { %v453_v58 = vsel %vm450_vm6, %v929_v6, %v445_v7 }
 0x1b4   :  { %v460_v19 = vmul.f32 %v456_v57, %v453_v58  ;;  %v530_v57 = vld [vmem:[#allocation2 + $0xe0] sm:$0xff] }
 0x1b9   :  { %v931_v9 = vpop.permute.xlu1 %448  ;;  %v945_v23 = vpop.permute.xlu2 %496 }
 0x1ba   :  { %v424_v10 = vpop.permute.xlu0 %423  ;;  %v454_v22 = vsel %vm450_vm6, %v931_v9, %v929_v6 }
 0x1bb   :  { %v426_v29 = vsel %vm425_vm5, %v422_v1, %v424_v10  ;;  %v429_v15 = vsel %vm425_vm5, %v424_v10, %v418_v61  ;;  %v436_v61 = vmul.f32 %v432_v46, %v427_v44  ;;  %v508_v1 = vld [vmem:[#allocation2 + $0xd8] sm:$0xff]  ;;  %v459_v33 = vmul.f32 %v455_v21, %v454_v22  ;;  %v555_v22 = vld [vmem:[#allocation2 + $0x100] sm:$0xff] }
 0x1bc   :  { %v437_v43 = vmul.f32 %v433_v28, %v426_v29  ;;  %v434_v56 = vmul.f32 %v430_v41, %v429_v15 }
 0x1bd   :  { %v440_v31 = vadd.f32 %v436_v61, %v925_v2  ;;  %v557_v61 = vld [vmem:[#allocation2 + $0x110] sm:$0xff] }
 0x1be   :  { %v441_v59 = vadd.f32 %v437_v43, %v416_v48  ;;  %v438_v20 = vadd.f32 %v434_v56, %v413_v62  ;;  %v558_v62 = vld [vmem:[#allocation2 + $0x118] sm:$0xff] }
 0x1c0   :  { %v463_v41 = vadd.f32 %v459_v33, %v438_v20 }
 0x1c1   :  { %v935_v12 = vpop.permute.xlu1 %467 }
 0x1c2   :  { %v447_v13 = vpop.permute.xlu0 %446  ;;  %v479_v0 = vsel %vm475_vm7, %v474_v16, %v935_v12  ;;  %v478_v6 = vsel %vm475_vm7, %v935_v12, %v927_v5  ;;  %v464_v12 = vadd.f32 %v460_v19, %v439_v4 }
 0x1c3   :  { %v451_v35 = vsel %vm450_vm6, %v447_v13, %v931_v9  ;;  %v452_v8 = vsel %vm450_vm6, %v445_v7, %v447_v13  ;;  %v487_v55 = vmul.f32 %v483_v63, %v479_v0  ;;  %v484_v15 = vmul.f32 %v480_v32, %v478_v6 }
 0x1c4   :  { %v462_v51 = vmul.f32 %v458_v34, %v451_v35  ;;  %v461_v25 = vmul.f32 %v457_v60, %v452_v8 }
 0x1c6   :  { %v971_v54 = vpop.permute.xlu2 %548  ;;  %v466_v10 = vadd.f32 %v462_v51, %v441_v59  ;;  %v465_v2 = vadd.f32 %v461_v25, %v440_v31  ;;  %v531_v59 = vld [vmem:[#allocation2 + $0xe8] sm:$0xff] }
 0x1c7   :  { %v556_v25 = vld [vmem:[#allocation2 + $0x108] sm:$0xff] }
 0x1c8   :  { %v491_v34 = vadd.f32 %v487_v55, %v466_v10 }
 0x1c9   :  { %v937_v14 = vpop.permute.xlu1 %471 }
 0x1ca   :  { %v939_v17 = vpop.permute.xlu0 %494  ;;  %v476_v7 = vsel %vm475_vm7, %v937_v14, %v474_v16  ;;  %v477_v16 = vsel %vm475_vm7, %v927_v5, %v937_v14  ;;  %v505_v14 = vld [vmem:[#allocation2 + $0xc0] sm:$0xff] }
 0x1cb   :  { %v486_v9 = vmul.f32 %v482_v18, %v476_v7  ;;  %v503_v35 = vsel %vm500_vm8, %v933_v11, %v939_v17  ;;  %v485_v36 = vmul.f32 %v481_v26, %v477_v16 }
 0x1cc   :  { %v509_v48 = vmul.f32 %v505_v14, %v503_v35 }
 0x1cd   :  { %v490_v51 = vadd.f32 %v486_v9, %v465_v2 }
 0x1ce   :  { %v520_v43 = vpop.permute.xlu2 %519 }
 0x1d1   :  { %v948_v24 = vpop.permute.xlu1 %542 }
 0x1d2   :  { %v954_v30 = vpop.permute.xlu0 %517 }
 0x1d3   :  { %v528_v38 = vsel %vm525_vm9, %v954_v30, %v520_v43 }
 0x1d4   :  { %v534_v4 = vmul.f32 %v530_v57, %v528_v38 }
 0x1d9   :  { %v524_v42 = vpop.permute.xlu1 %523 }
 0x1da   :  { %v499_v3 = vpop.permute.xlu0 %498  ;;  %v529_v5 = vsel %vm525_vm9, %v524_v42, %v954_v30  ;;  %v554_v30 = vsel %vm550_vm10, %v971_v54, %v948_v24 }
 0x1db   :  { %v504_v13 = vsel %vm500_vm8, %v499_v3, %v933_v11  ;;  %v501_v28 = vsel %vm500_vm8, %v945_v23, %v499_v3  ;;  %v502_v11 = vsel %vm500_vm8, %v939_v17, %v945_v23  ;;  %v537_v58 = vmul.f32 %v533_v40, %v529_v5 }
 0x1dc   :  { %v512_v29 = vmul.f32 %v508_v1, %v504_v13  ;;  %v511_v37 = vmul.f32 %v507_v27, %v501_v28  ;;  %v489_v23 = vadd.f32 %v485_v36, %v464_v12  ;;  %v488_v1 = vadd.f32 %v484_v15, %v463_v41 }
 0x1dd   :  { %v510_v3 = vmul.f32 %v506_v47, %v502_v11  ;;  %v562_v13 = vmul.f32 %v558_v62, %v554_v30 }
 0x1de   :  { %v516_v44 = vadd.f32 %v512_v29, %v491_v34  ;;  %v515_v63 = vadd.f32 %v511_v37, %v490_v51  ;;  %v513_v19 = vadd.f32 %v509_v48, %v488_v1 }
 0x1df   :  { %v514_v20 = vadd.f32 %v510_v3, %v489_v23 }
 0x1e0   :  { %v538_v16 = vadd.f32 %v534_v4, %v513_v19 }
 0x1e1   :  { %v547_v46 = vpop.permute.xlu1 %546 }
 0x1e2   :  { %v522_v56 = vpop.permute.xlu0 %521  ;;  %v551_v17 = vsel %vm550_vm10, %v547_v46, %v971_v54 }
 0x1e3   :  { %v526_v60 = vsel %vm525_vm9, %v522_v56, %v524_v42  ;;  %v527_v8 = vsel %vm525_vm9, %v520_v43, %v522_v56  ;;  %v541_v42 = vadd.f32 %v537_v58, %v516_v44  ;;  %v561_v7 = vmul.f32 %v557_v61, %v551_v17 }
 0x1e4   :  { %v536_v0 = vmul.f32 %v532_v45, %v526_v60  ;;  %v535_v10 = vmul.f32 %v531_v59, %v527_v8 }
 0x1e5   :  { %v566_v55 = vadd.f32 %v562_v13, %v541_v42 }
 0x1e6   :  { %v540_v18 = vadd.f32 %v536_v0, %v515_v63  ;;  %v539_v27 = vadd.f32 %v535_v10, %v514_v20 }
 0x1e8   :  { %v565_v21 = vadd.f32 %v561_v7, %v540_v18 }
 0x1e9   :  { %v545_v26 = vpop.permute.xlu1 %544 }
 0x1ea   :  { %v570_v54 = vpop.permute.xlu0 %569  ;;  %v552_v28 = vsel %vm550_vm10, %v545_v26, %v547_v46  ;;  %v553_v29 = vsel %vm550_vm10, %v948_v24, %v545_v26  ;;  %v580_v24 = vld [vmem:[%s1059_s3] sm:$0x3]  ;;  %v79_v46 = vpop.permute.xlu2 %78 }
 0x1eb   :  { %v574_v31 = vadd.f32 %v570_v54, %v565_v21  ;;  %v575_v32 = vadd.f32 %v570_v54, %v566_v55  ;;  %v559_v6 = vmul.f32 %v555_v22, %v553_v29  ;;  %v560_v9 = vmul.f32 %v556_v25, %v552_v28 }
 0x1ec   :  { %v124_v47 = vadd.f32 %v883_v49, %v79_v46  ;;  %v142_v11 = vadd.f32 %v885_v50, %v79_v46  ;;  %v178_v57 = vadd.f32 %v889_v52, %v79_v46  ;;  %v160_v58 = vadd.f32 %v891_v53, %v79_v46 }
 0x1ed   :  { %v578_v33 = vmax.f32 %v574_v31, 0.0  ;;  %v579_v34 = vmax.f32 %v575_v32, 0.0  ;;  %v563_v14 = vadd.f32 %v559_v6, %v538_v16  ;;  %v564_v35 = vadd.f32 %v560_v9, %v539_v27 }
 0x1ef   :  { %v583_v2 = vpack.c.bf16 %v578_v33, %v578_v33  ;;  %v584_v36 = vpack.c.bf16 %v579_v34, %v579_v34  ;;  %v572_v37 = vadd.f32 %v570_v54, %v563_v14  ;;  %v573_v40 = vadd.f32 %v570_v54, %v564_v35 }
 0x1f1   :  { %v597_v5 = vsel %vm589_vm11, %v583_v2, 0  ;;  %v600_v12 = vsel %vm589_vm11, %v584_v36, 0  ;;  %v576_v41 = vmax.f32 %v572_v37, 0.0  ;;  %v577_v39 = vmax.f32 %v573_v40, 0.0 }
 0x1f2   :  { %635 = vmatpush.bf16.msra.mxu2 %v597_v5  ;;  %648 = vmatpush.bf16.msra.mxu3 %v600_v12 }
 0x1f3   :  { %v581_v15 = vpack.c.bf16 %v576_v41, %v576_v41  ;;  %v582_v43 = vpack.c.bf16 %v577_v39, %v577_v39 }
 0x1f5   :  { %725 = vmatmul.msk.bf16.vlgmr.msra.gmra.mxu2 %vm585_vm12, %v580_v24  ;;  %726 = vmatmul.msk.bf16.vlgmr.msra.gmra.mxu3 %vm585_vm12, %v580_v24  ;;  %v591_v44 = vsel %vm589_vm11, %v581_v15, 0  ;;  %v594_v45 = vsel %vm589_vm11, %v582_v43, 0 }
 0x1f6   :  { %609 = vmatpush.bf16.msra.mxu0 %v591_v44  ;;  %622 = vmatpush.bf16.msra.mxu1 %v594_v45 }
 0x1f9   :  { %723 = vmatmul.msk.bf16.vlgmr.msra.gmra.mxu0 %vm585_vm12, %v580_v24  ;;  %724 = vmatmul.msk.bf16.vlgmr.msra.gmra.mxu1 %vm585_vm12, %v580_v24 }
 0x276   :  { %v611_v48 = vpop.f32.mrf.mxu0  ;;  %v624_v51 = vpop.f32.mrf.mxu1 }
 0x277   :  { %v612_v38 = vadd.f32 %v611_v48, %v124_v47  ;;  %v625_v56 = vadd.f32 %v624_v51, %v142_v11 }
 0x278   :  { %v637_v59 = vpop.f32.mrf.mxu2  ;;  %v650_v60 = vpop.f32.mrf.mxu3 }
 0x279   :  { %v651_v8 = vadd.f32 %v650_v60, %v178_v57  ;;  %746 = vtanh.f32 %v625_v56  ;;  %v638_v61 = vadd.f32 %v637_v59, %v160_v58 }
 0x27a   :  { %748 = vtanh.f32 %v612_v38 }
 0x27b   :  { %750 = vtanh.f32 %v651_v8 }
 0x27c   :  { %752 = vtanh.f32 %v638_v61 }
 0x27e   :  { %v626_v17 = vpop.f32.mrf.mxu1  ;;  %v613_v49 = vpop.f32.mrf.mxu0 }
 0x27f   :  { %v747_v23 = vpop.eup %746 }
 0x280   :  { %v652_v50 = vpop.f32.mrf.mxu3  ;;  %v639_v62 = vpop.f32.mrf.mxu2  ;;  %v662_v63 = vrot.slane %v747_v23, 4 }
 0x281   :  { %v749_v30 = vpop.eup %748 }
 0x282   :  { %v751_v0 = vpop.eup %750  ;;  %v664_v52 = vsel %vm589_vm11, %v749_v30, %v662_v63 }
 0x283   :  { %v663_v1 = vrot.slane %v751_v0, 4  ;;  %v753_v53 = vpop.eup %752  ;;  %668 = vst [vmem:[%s1062_s6] sm:$0x77] %v664_v52 }
 0x285   :  { %v665_v3 = vsel %vm589_vm11, %v753_v53, %v663_v1 }
 0x286   :  { %669 = vst [vmem:[%s1062_s6 + $0x8] sm:$0x77] %v665_v3 }
 0x287   :  { %674 = vsyncpa [#allocation3], 1 }

</bundles_post_ra>
